<compile_context>
chip_gen: v7x
topology: tpu7x:2x2x1
jax: 0.10.0
libtpu: 0.0.40
codegen_flags: <defaults>
</compile_context>

<pallas_src>
import functools

import jax
import jax.numpy as jnp
from jax import lax
from jax.experimental import pallas as pl
from jax.experimental.pallas import tpu as pltpu


def _round_up(x, m):
    return ((x + m - 1) // m) * m


# ----------------------------------------------------------------------------
# Kernel
# ----------------------------------------------------------------------------
def _target_feat_kernel(delta_ref, tf_ref, out_ref, *, unk_start):
    # delta_ref: (TILE_N, 1)  f32   — one clamped mixing weight per residue
    # tf_ref:    (TILE_N, CK)       — init target_feat, native (N, C*K) layout
    # out_ref:   (TILE_N, CK)
    d = jnp.clip(delta_ref[...].astype(jnp.float32), 0.0, 1.0)      # (TILE_N, 1)
    tf = tf_ref[...].astype(jnp.float32)                            # (TILE_N, CK)
    rows, cols = tf.shape
    # unk == 1 on lanes belonging to aa-class 21 (columns 84..87), else 0,
    # so unk * d == where(col >= unk_start, d, 0).  Exact reference formula.
    col = lax.broadcasted_iota(jnp.int32, (rows, cols), dimension=1)
    unk_times_d = jnp.where(col >= unk_start, d, 0.0)
    out_ref[...] = (tf * (1.0 - d) + unk_times_d).astype(out_ref.dtype)


# ----------------------------------------------------------------------------
# Forward implementation (pallas path + small-N XLA fast path)
# ----------------------------------------------------------------------------
def _get_target_feat_impl(delta, init_target_feat, *, tile_n=8192,
                          use_pallas=None):
    """Forward of EXPGenerator.get_target_feat.

    delta:            (N,)        float (the nn.Parameter)
    init_target_feat: (N, 22, 4)  float
    returns:          (N, 22, 4)  same dtype as init_target_feat
    """
    N, C, K = init_target_feat.shape
    CK = C * K
    out_dtype = init_target_feat.dtype

    if use_pallas is None:
        # Below ~4 MiB of HBM traffic a fused XLA elementwise pass wins
        # (covers essentially all realistic protein lengths).
        use_pallas = (N * CK * 4) >= (4 << 20)

    if not use_pallas:
        d3 = jnp.clip(delta.astype(jnp.float32), 0.0, 1.0)[:, None, None]
        unk = jnp.zeros((N, C, K), jnp.float32).at[:, C - 1, :].set(1.0)
        out = init_target_feat.astype(jnp.float32) * (1.0 - d3) + unk * d3
        return out.astype(out_dtype)

    # Native-layout views: no transpose, no full-array pad.
    tf2d = init_target_feat.reshape(N, CK)                 # contiguous reshape
    d_col = delta.reshape(N, 1).astype(jnp.float32)        # (N, 1) column

    # Tile N (sublane axis) in multiples of 8.  Ragged last block is handled
    # by the Pallas pipeline (padded read, masked write).
    tile = min(tile_n, _round_up(N, 8))
    if tile >= N and N >= 1024:
        # Guarantee >=2 grid steps so ("parallel",) can use both v7x TCs.
        tile = _round_up(pl.cdiv(N, 2), 8)
    num_steps = pl.cdiv(N, tile)

    kernel = functools.partial(_target_feat_kernel, unk_start=(C - 1) * K)

    out2d = pl.pallas_call(
        kernel,
        out_shape=jax.ShapeDtypeStruct((N, CK), out_dtype),
        grid=(num_steps,),
        in_specs=[
            pl.BlockSpec((tile, 1), lambda i: (i, 0)),     # delta column
            pl.BlockSpec((tile, CK), lambda i: (i, 0)),    # target_feat slab
        ],
        out_specs=pl.BlockSpec((tile, CK), lambda i: (i, 0)),
        compiler_params=pltpu.CompilerParams(
            dimension_semantics=("parallel",),
            vmem_limit_bytes=32 * 1024 * 1024,
        ),
    )(d_col, tf2d)

    return out2d.reshape(N, C, K)


# ----------------------------------------------------------------------------
# Differentiable public entry point (delta is a trainable parameter)
# ----------------------------------------------------------------------------
@jax.custom_vjp
def get_target_feat(delta, init_target_feat):
    return _get_target_feat_impl(delta, init_target_feat)


def _get_target_feat_fwd(delta, init_target_feat):
    out = _get_target_feat_impl(delta, init_target_feat)
    return out, (delta, init_target_feat)


def _get_target_feat_bwd(res, g):
    delta, tf = res
    N, C, K = tf.shape
    g32 = g.astype(jnp.float32)
    d = jnp.clip(delta.astype(jnp.float32), 0.0, 1.0)
    d3 = d[:, None, None]
    # d out / d tf = (1 - d)
    d_tf = (g32 * (1.0 - d3)).astype(tf.dtype)
    # d out / d delta = (unk - tf), gated by the clamp's pass-through region.
    unk = jnp.zeros((N, C, K), jnp.float32).at[:, C - 1, :].set(1.0)
    gate = ((delta >= 0.0) & (delta <= 1.0)).astype(jnp.float32)
    d_delta = (jnp.sum(g32 * (unk - tf.astype(jnp.float32)), axis=(1, 2))
               * gate).astype(delta.dtype)
    return d_delta, d_tf


get_target_feat.defvjp(_get_target_feat_fwd, _get_target_feat_bwd)


# ----------------------------------------------------------------------------
# Module forward
# ----------------------------------------------------------------------------
def exp_generator_forward(delta, init_feature_dict, processed_feature_dict):
    """EXPGenerator.forward semantics (minus the external base_model call)."""
    target_feat = get_target_feat(delta, init_feature_dict["target_feat"])
    processed_feature_dict = dict(processed_feature_dict)
    processed_feature_dict["target_feat"] = target_feat
    # TODO(synk): self.base_model(processed_feature_dict) is an external
    # AlphaFold-style network and cannot be expressed as a Pallas kernel here.
    return processed_feature_dict


# ----------------------------------------------------------------------------
# Pure-JAX reference
# ----------------------------------------------------------------------------
def _reference_target_feat(delta, init_target_feat):
    N, C, K = init_target_feat.shape
    clamped = jnp.clip(delta, 0.0, 1.0)
    unk = jnp.zeros_like(init_target_feat).at[:, C - 1, :].set(1.0)
    d3 = jnp.broadcast_to(clamped[:, None, None], (N, C, K))
    return init_target_feat * (1.0 - d3) + unk * d3


if __name__ == "__main__":
    key = jax.random.PRNGKey(0)
    k1, k2, k3, k4 = jax.random.split(key, 4)

    # Small shapes consistent with the module: seq=8 residues, 22 aa classes,
    # 4 recycling copies.
    N, C, K = 8, 22, 4
    delta = jax.random.uniform(k1, (N,), jnp.float32, minval=-0.5, maxval=1.5)
    init_target_feat = jax.random.uniform(k2, (N, C, K), jnp.float32)

    # 1) Force the pallas path at the small test size (single grid step).
    out_small = jax.block_until_ready(
        _get_target_feat_impl(delta, init_target_feat, use_pallas=True))
    ref_small = _reference_target_feat(delta, init_target_feat)
    assert out_small.shape == (N, C, K)
    assert jnp.allclose(out_small, ref_small, atol=1e-6), \
        "Pallas kernel mismatch (small N)"

    # 2) Multi-step grid + ragged last block (N not a multiple of the tile).
    N2 = 1500
    delta2 = jax.random.uniform(k3, (N2,), jnp.float32, minval=-0.5, maxval=1.5)
    tf2 = jax.random.uniform(k4, (N2, C, K), jnp.float32)
    out2 = jax.block_until_ready(
        _get_target_feat_impl(delta2, tf2, use_pallas=True))
    ref2 = _reference_target_feat(delta2, tf2)
    assert out2.shape == (N2, C, K)
    assert jnp.allclose(out2, ref2, atol=1e-6), "Pallas kernel mismatch (grid N)"

    # 3) Module forward wrapper (auto path: small-N XLA fast path).
    out_dict = exp_generator_forward(delta, {"target_feat": init_target_feat},
                                     {"target_feat": jnp.zeros_like(init_target_feat)})
    out_fwd = jax.block_until_ready(out_dict["target_feat"])
    assert jnp.allclose(out_fwd, ref_small, atol=1e-6), "forward mismatch"

    # 4) Gradient through the custom_vjp (delta is a trainable parameter).
    loss = lambda d, tf, f: jnp.sum(f(d, tf) * ref_small)
    g_kernel = jax.grad(loss)(delta, init_target_feat, get_target_feat)
    g_ref = jax.grad(loss)(delta, init_target_feat, _reference_target_feat)
    assert jnp.allclose(jax.block_until_ready(g_kernel), g_ref, atol=1e-5), \
        "custom_vjp gradient mismatch"

    print("KERNEL_OK")
</pallas_src>

<mosaic_0001>
module attributes {stable_mosaic.version = 11 : i64} {
  func.func @_target_feat_kernel(%arg0: i32, %arg1: memref<8x1xf32, #tpu.memory_space<vmem>>, %arg2: memref<8x88xf32, #tpu.memory_space<vmem>>, %arg3: memref<8x88xf32, #tpu.memory_space<vmem>>) attributes {dimension_semantics = [#tpu.dimension_semantics<parallel>], iteration_bounds = array<i64: 1>, scalar_prefetch = 0 : i64, scratch_operands = 0 : i64, tpu.core_type = #tpu.core_type<tc>, window_params = [{transform_indices = @transform_0, window_bounds = array<i64: 8, 1>}, {transform_indices = @transform_1, window_bounds = array<i64: 8, 88>}, {transform_indices = @transform_2, window_bounds = array<i64: 8, 88>}]} {
    %c0 = arith.constant 0 : index
    %c0_0 = arith.constant 0 : index
    %0 = vector.load %arg1[%c0, %c0_0] : memref<8x1xf32, #tpu.memory_space<vmem>>, vector<8x1xf32>
    %cst = arith.constant 0.000000e+00 : f32
    %cst_1 = arith.constant 1.000000e+00 : f32
    %1 = vector.broadcast %cst : f32 to vector<8x1xf32>
    %2 = arith.maximumf %1, %0 : vector<8x1xf32>
    %3 = vector.broadcast %cst_1 : f32 to vector<8x1xf32>
    %4 = arith.minimumf %3, %2 : vector<8x1xf32>
    %c0_2 = arith.constant 0 : index
    %c0_3 = arith.constant 0 : index
    %5 = vector.load %arg2[%c0_2, %c0_3] : memref<8x88xf32, #tpu.memory_space<vmem>>, vector<8x88xf32>
    %6 = tpu.iota {dimensions = array<i32: 1>} : vector<8x88xi32>
    %c84_i32 = arith.constant 84 : i32
    %7 = vector.broadcast %c84_i32 : i32 to vector<8x88xi32>
    %8 = arith.cmpi sge, %6, %7 : vector<8x88xi32>
    %cst_4 = arith.constant 0.000000e+00 : f32
    %9 = vector.shape_cast %4 : vector<8x1xf32> to vector<8x1xf32>
    %10 = vector.broadcast %9 : vector<8x1xf32> to vector<8x88xf32>
    %11 = vector.broadcast %cst_4 : f32 to vector<8x88xf32>
    %12 = arith.select %8, %10, %11 : vector<8x88xi1>, vector<8x88xf32>
    %cst_5 = arith.constant 1.000000e+00 : f32
    %13 = vector.broadcast %cst_5 : f32 to vector<8x1xf32>
    %14 = arith.subf %13, %4 : vector<8x1xf32>
    %15 = vector.broadcast %14 : vector<8x1xf32> to vector<8x88xf32>
    %16 = arith.mulf %5, %15 : vector<8x88xf32>
    %17 = arith.addf %16, %12 : vector<8x88xf32>
    %c0_6 = arith.constant 0 : index
    %c0_7 = arith.constant 0 : index
    %18 = vector.load %arg3[%c0_6, %c0_7] : memref<8x88xf32, #tpu.memory_space<vmem>>, vector<8x88xf32>
    tpu.vector_store %arg3[%c0_6, %c0_7], %17 {strides = array<i32>} : memref<8x88xf32, #tpu.memory_space<vmem>>, vector<8x88xf32>,
    return
  }
  func.func @transform_0(%arg0: i32) -> (i32, i32) {
    %c0_i32 = arith.constant 0 : i32
    %c0_i32_0 = arith.constant 0 : i32
    return %arg0, %c0_i32 : i32, i32
  }
  func.func @transform_1(%arg0: i32) -> (i32, i32) {
    %c0_i32 = arith.constant 0 : i32
    %c0_i32_0 = arith.constant 0 : i32
    return %arg0, %c0_i32 : i32, i32
  }
  func.func @transform_2(%arg0: i32) -> (i32, i32) {
    %c0_i32 = arith.constant 0 : i32
    %c0_i32_0 = arith.constant 0 : i32
    return %arg0, %c0_i32 : i32, i32
  }
}

</mosaic_0001>

<bundles_post_ra>
// kernel: tpu_custom_call.1
= control target key start
LH: loop header
LB: loop body
LE: loop exit
PB: predicated region body
PF: predicated region fallthrough
CT: control target
= control target key end

     0   :  { %s111_s0 = inlined_call_operand.vmem [shape: f32[8,1], index: 0, kind: input, shape index: {}]   ;;  %s112_s1 = inlined_call_operand.vmem [shape: f32[8,88], index: 1, kind: input, shape index: {}]   ;;  %s113_s2 = inlined_call_operand.hbm [shape: f32[8,88], index: 2, kind: output, shape index: {}]  }
   0x1   :  { %v12_v0 = vld [vmem:[%s111_s0] sm:$0xff] }
   0x2   :  { %7 = vsyncpa [#allocation3], 0  ;;  %v76_v1 = vmov 0   ;;  %v13_v2 = vmax.f32 %v12_v0, 0.0  ;;  %v16_v5 = vlaneseq  ;;  %v15_v8 = vld [vmem:[%s112_s1] sm:$0xff]  ;;  %s77_s13 = smov [#allocation2]  }
   0x3   :  { %51 = vset.pattern.permute.xlu0 %v76_v1  ;;  %s41_s14 = sshll.u32 %s77_s13, 4  ;;  %vm33_vm1 = vcmask 719872   ;;  %s42_s14 = int_to_ptr.vmem [resolvable:$true] %s41_s14 }
   0x4   :  { %v14_v3 = vmin.f32 %v13_v2, 1.0  ;;  %v17_v6 = vand.u32 127, %v16_v5  ;;  %s52_s0 = scalar_lea.vmem %s42_s14, 128  ;;  %p57_p1 = scmp.lt.s32.totalorder %s42_s14, %s42_s14 }
   0x5   :  { %p53_p0 = scmp.ne.s32.totalorder %s42_s14, %s52_s0  ;;  %p58_p2 = scmp.lt.s32.totalorder %s52_s0, %s52_s0 }
   0x6   :  { %v25_v4 = vsub.f32 1.0, %v14_v3  ;;  %vm18_vm0 = vcmp.ge.s32.totalorder %v17_v6, 84 }
   0x7   :  { %p59_p3 = por %p58_p2, %p57_p1 }
   0x8   :  { %28 = vperm.xlu0 %51, %v25_v4  }
   0x9   :  { %p60_p4 = pnand %p59_p3, %p53_p0 }
   0xc   :  { %21 = vperm.xlu0 %51, %v14_v3  }
  0x87   :  { %v29_v7 = vpop.permute.xlu0 %28 }
  0x88   :  { %v31_v9 = vmul.f32 %v29_v7, %v15_v8 }
  0x8b   :  { %v22_v10 = vpop.permute.xlu0 %21 }
  0x8c   :  { %v24_v11 = vsel %vm18_vm0, %v22_v10, 0.0 }
  0x8d   :  { %v32_v12 = vadd.f32 %v31_v9, %v24_v11 }
  0x8f   :  { %34 = vst.msk [vmem:[#allocation2] sm:$0xff] %vm33_vm1, %v32_v12 }
  0x90   :  { %63 = shalt.err (!%p60_p4)
}
  0x91   :  { %s64_s1 = scalar_lea.hbm %s113_s2, 128 }
  0x92   :  { %p65_p5 = scmp.ne.s32.totalorder %s113_s2, %s64_s1  ;;  %p68_p6 = scmp.lt.u32.totalorder %s64_s1, %s113_s2 }
  0x94   :  { %p70_p7 = pnand %p68_p6, %p65_p5 }
  0x96   :  { %73 = shalt.err (!%p70_p7)
}
  0x97   :  { %44 = dma.vmem_to_hbm [thread:$0]  %s42_s14, 128, %s113_s2, [#allocation3]  }
  0x98   :  { %74 = dma.done.wait [#allocation3], 128  }
  0x99   :  { %75 = vsyncadd [#allocation3], 4294967168 }
  0x9a   :  { %48 = vsyncpa [#allocation3], 1 }

</bundles_post_ra>
